<compile_context>
chip_gen: v7x
topology: tpu7x:2x2x1
jax: 0.10.0
libtpu: 0.0.40
codegen_flags: <defaults>
</compile_context>

<pallas_src>
import jax
import jax.numpy as jnp
from jax.experimental import pallas as pl
from jax.experimental.pallas import tpu as pltpu


_LANE = 128        # vreg lane width
_MAX_TC = 2048     # lane extent of one tile (batch is lane-dense)
_MAX_TR = 8        # sublane extent of one tile
_N_HIDDEN = 10


def mlp_kernel(params_ref, x_ref, o_ref):
    # params_ref: SMEM (32,) f32 = [w1(10) | b1(10) | w2(10) | b2 | pad]
    # x_ref/o_ref: (TR, TC) tiles; the flattened batch is lane-dense.
    x = x_ref[...].astype(jnp.float32)            # (TR, TC)
    acc = jnp.full_like(x, params_ref[30])        # start from output bias b2
    # Unrolled 10-term FMA chain over the hidden units: features are SMEM
    # scalars broadcast into VPU ops; batch stays lane-dense. No XLU reduce.
    for j in range(_N_HIDDEN):
        w1_j = params_ref[j]
        b1_j = params_ref[_N_HIDDEN + j]
        w2_j = params_ref[2 * _N_HIDDEN + j]
        pre = x * w1_j + b1_j
        # sigmoid(pre): exp on the EUP, approx reciprocal also rides the EUP
        h = pl.reciprocal(1.0 + jnp.exp(-pre), approx=True)
        acc = acc + w2_j * h
    o_ref[...] = acc.astype(o_ref.dtype)


def _round_up(n, m):
    return ((n + m - 1) // m) * m


def network_forward(x, w1, b1, w2, b2):
    """x: (B, 1). w1: (10, 1), b1: (10,), w2: (1, 10), b2: (1,). Returns (B, 1) f32."""
    B = x.shape[0]

    # Pack all 31 scalar parameters into one small SMEM-resident vector.
    params = jnp.concatenate([
        w1.reshape(-1).astype(jnp.float32),
        b1.reshape(-1).astype(jnp.float32),
        w2.reshape(-1).astype(jnp.float32),
        b2.reshape(-1).astype(jnp.float32),
        jnp.zeros((1,), jnp.float32),             # pad to 32
    ])

    # Lane-dense re-layout of the batch: flatten, pad to a (rows_pad, TC) slab.
    x_flat = x.reshape(-1)                        # (B,)
    B_lane = _round_up(B, _LANE)
    TC = min(_MAX_TC, B_lane)
    rows = pl.cdiv(B_lane, TC)
    if rows <= _MAX_TR:
        TR = rows                                 # block == full dim, allowed
        rows_pad = rows
    else:
        TR = _MAX_TR
        rows_pad = _round_up(rows, TR)
    B_pad = rows_pad * TC
    if B_pad != B:
        x_flat = jnp.pad(x_flat, (0, B_pad - B))
    x2d = x_flat.reshape(rows_pad, TC)
    num_tiles = rows_pad // TR

    out2d = pl.pallas_call(
        mlp_kernel,
        out_shape=jax.ShapeDtypeStruct((rows_pad, TC), jnp.float32),
        grid=(num_tiles,),
        in_specs=[
            pl.BlockSpec(memory_space=pltpu.MemorySpace.SMEM),   # packed params
            pl.BlockSpec((TR, TC), lambda i: (i, 0)),            # x tile
        ],
        out_specs=pl.BlockSpec((TR, TC), lambda i: (i, 0)),
        compiler_params=pltpu.CompilerParams(
            dimension_semantics=("parallel",),    # shards batch tiles on v7x's 2 TCs
        ),
    )(params, x2d)

    return out2d.reshape(-1)[:B].reshape(B, 1)


def init_params(key):
    """Deterministic params mimicking nn.Linear default init (U[-1/sqrt(fan_in), +])."""
    k1, k2, k3, k4 = jax.random.split(key, 4)
    bound1 = 1.0 / jnp.sqrt(1.0)   # hidden_layer: fan_in = 1
    bound2 = 1.0 / jnp.sqrt(10.0)  # output_layer: fan_in = 10
    w1 = jax.random.uniform(k1, (10, 1), jnp.float32, -bound1, bound1)
    b1 = jax.random.uniform(k2, (10,), jnp.float32, -bound1, bound1)
    w2 = jax.random.uniform(k3, (1, 10), jnp.float32, -bound2, bound2)
    b2 = jax.random.uniform(k4, (1,), jnp.float32, -bound2, bound2)
    return w1, b1, w2, b2


def reference_forward(x, w1, b1, w2, b2):
    h = jax.nn.sigmoid(x @ w1.T + b1)
    return h @ w2.T + b2


if __name__ == "__main__":
    key = jax.random.PRNGKey(0)
    kx, kp = jax.random.split(key)
    batch = 8
    x = jax.random.normal(kx, (batch, 1), jnp.float32)
    w1, b1, w2, b2 = init_params(kp)

    out = network_forward(x, w1, b1, w2, b2)
    out = jax.block_until_ready(out)

    ref = reference_forward(x, w1, b1, w2, b2)
    assert out.shape == (batch, 1)
    # approx reciprocal in the sigmoid => ~1e-3-level error budget
    assert jnp.allclose(out, ref, atol=5e-3, rtol=5e-3), float(jnp.max(jnp.abs(out - ref)))
    print("KERNEL_OK")
</pallas_src>

<mosaic_0001>
module attributes {stable_mosaic.version = 11 : i64} {
  func.func @mlp_kernel(%arg0: i32, %arg1: memref<32xf32, #tpu.memory_space<smem>>, %arg2: memref<1x128xf32, #tpu.memory_space<vmem>>, %arg3: memref<1x128xf32, #tpu.memory_space<vmem>>) attributes {dimension_semantics = [#tpu.dimension_semantics<parallel>], iteration_bounds = array<i64: 1>, scalar_prefetch = 0 : i64, scratch_operands = 0 : i64, tpu.core_type = #tpu.core_type<tc>, window_params = [{transform_indices = @transform_0, window_bounds = array<i64: 32>}, {transform_indices = @transform_1, window_bounds = array<i64: 1, 128>}, {transform_indices = @transform_2, window_bounds = array<i64: 1, 128>}]} {
    %c0 = arith.constant 0 : index
    %c0_0 = arith.constant 0 : index
    %0 = vector.load %arg2[%c0, %c0_0] : memref<1x128xf32, #tpu.memory_space<vmem>>, vector<1x128xf32>
    %c30 = arith.constant 30 : index
    %1 = memref.load %arg1[%c30] : memref<32xf32, #tpu.memory_space<smem>>
    %2 = vector.broadcast %1 : f32 to vector<1x128xf32>
    %c0_1 = arith.constant 0 : index
    %3 = memref.load %arg1[%c0_1] : memref<32xf32, #tpu.memory_space<smem>>
    %c10 = arith.constant 10 : index
    %4 = memref.load %arg1[%c10] : memref<32xf32, #tpu.memory_space<smem>>
    %c20 = arith.constant 20 : index
    %5 = memref.load %arg1[%c20] : memref<32xf32, #tpu.memory_space<smem>>
    %6 = vector.broadcast %3 : f32 to vector<1x128xf32>
    %7 = arith.mulf %0, %6 : vector<1x128xf32>
    %8 = vector.broadcast %4 : f32 to vector<1x128xf32>
    %9 = arith.addf %7, %8 : vector<1x128xf32>
    %cst = arith.constant 0.000000e+00 : f32
    %10 = vector.broadcast %cst : f32 to vector<1x128xf32>
    %11 = arith.subf %10, %9 : vector<1x128xf32>
    %12 = math.exp %11 : vector<1x128xf32>
    %cst_2 = arith.constant 1.000000e+00 : f32
    %13 = vector.broadcast %cst_2 : f32 to vector<1x128xf32>
    %14 = arith.addf %13, %12 : vector<1x128xf32>
    %15 = tpu.reciprocal %14 {approx = true} : vector<1x128xf32> -> vector<1x128xf32>
    %16 = vector.broadcast %5 : f32 to vector<1x128xf32>
    %17 = arith.mulf %16, %15 : vector<1x128xf32>
    %18 = arith.addf %2, %17 : vector<1x128xf32>
    %c1 = arith.constant 1 : index
    %19 = memref.load %arg1[%c1] : memref<32xf32, #tpu.memory_space<smem>>
    %c11 = arith.constant 11 : index
    %20 = memref.load %arg1[%c11] : memref<32xf32, #tpu.memory_space<smem>>
    %c21 = arith.constant 21 : index
    %21 = memref.load %arg1[%c21] : memref<32xf32, #tpu.memory_space<smem>>
    %22 = vector.broadcast %19 : f32 to vector<1x128xf32>
    %23 = arith.mulf %0, %22 : vector<1x128xf32>
    %24 = vector.broadcast %20 : f32 to vector<1x128xf32>
    %25 = arith.addf %23, %24 : vector<1x128xf32>
    %cst_3 = arith.constant 0.000000e+00 : f32
    %26 = vector.broadcast %cst_3 : f32 to vector<1x128xf32>
    %27 = arith.subf %26, %25 : vector<1x128xf32>
    %28 = math.exp %27 : vector<1x128xf32>
    %cst_4 = arith.constant 1.000000e+00 : f32
    %29 = vector.broadcast %cst_4 : f32 to vector<1x128xf32>
    %30 = arith.addf %29, %28 : vector<1x128xf32>
    %31 = tpu.reciprocal %30 {approx = true} : vector<1x128xf32> -> vector<1x128xf32>
    %32 = vector.broadcast %21 : f32 to vector<1x128xf32>
    %33 = arith.mulf %32, %31 : vector<1x128xf32>
    %34 = arith.addf %18, %33 : vector<1x128xf32>
    %c2 = arith.constant 2 : index
    %35 = memref.load %arg1[%c2] : memref<32xf32, #tpu.memory_space<smem>>
    %c12 = arith.constant 12 : index
    %36 = memref.load %arg1[%c12] : memref<32xf32, #tpu.memory_space<smem>>
    %c22 = arith.constant 22 : index
    %37 = memref.load %arg1[%c22] : memref<32xf32, #tpu.memory_space<smem>>
    %38 = vector.broadcast %35 : f32 to vector<1x128xf32>
    %39 = arith.mulf %0, %38 : vector<1x128xf32>
    %40 = vector.broadcast %36 : f32 to vector<1x128xf32>
    %41 = arith.addf %39, %40 : vector<1x128xf32>
    %cst_5 = arith.constant 0.000000e+00 : f32
    %42 = vector.broadcast %cst_5 : f32 to vector<1x128xf32>
    %43 = arith.subf %42, %41 : vector<1x128xf32>
    %44 = math.exp %43 : vector<1x128xf32>
    %cst_6 = arith.constant 1.000000e+00 : f32
    %45 = vector.broadcast %cst_6 : f32 to vector<1x128xf32>
    %46 = arith.addf %45, %44 : vector<1x128xf32>
    %47 = tpu.reciprocal %46 {approx = true} : vector<1x128xf32> -> vector<1x128xf32>
    %48 = vector.broadcast %37 : f32 to vector<1x128xf32>
    %49 = arith.mulf %48, %47 : vector<1x128xf32>
    %50 = arith.addf %34, %49 : vector<1x128xf32>
    %c3 = arith.constant 3 : index
    %51 = memref.load %arg1[%c3] : memref<32xf32, #tpu.memory_space<smem>>
    %c13 = arith.constant 13 : index
    %52 = memref.load %arg1[%c13] : memref<32xf32, #tpu.memory_space<smem>>
    %c23 = arith.constant 23 : index
    %53 = memref.load %arg1[%c23] : memref<32xf32, #tpu.memory_space<smem>>
    %54 = vector.broadcast %51 : f32 to vector<1x128xf32>
    %55 = arith.mulf %0, %54 : vector<1x128xf32>
    %56 = vector.broadcast %52 : f32 to vector<1x128xf32>
    %57 = arith.addf %55, %56 : vector<1x128xf32>
    %cst_7 = arith.constant 0.000000e+00 : f32
    %58 = vector.broadcast %cst_7 : f32 to vector<1x128xf32>
    %59 = arith.subf %58, %57 : vector<1x128xf32>
    %60 = math.exp %59 : vector<1x128xf32>
    %cst_8 = arith.constant 1.000000e+00 : f32
    %61 = vector.broadcast %cst_8 : f32 to vector<1x128xf32>
    %62 = arith.addf %61, %60 : vector<1x128xf32>
    %63 = tpu.reciprocal %62 {approx = true} : vector<1x128xf32> -> vector<1x128xf32>
    %64 = vector.broadcast %53 : f32 to vector<1x128xf32>
    %65 = arith.mulf %64, %63 : vector<1x128xf32>
    %66 = arith.addf %50, %65 : vector<1x128xf32>
    %c4 = arith.constant 4 : index
    %67 = memref.load %arg1[%c4] : memref<32xf32, #tpu.memory_space<smem>>
    %c14 = arith.constant 14 : index
    %68 = memref.load %arg1[%c14] : memref<32xf32, #tpu.memory_space<smem>>
    %c24 = arith.constant 24 : index
    %69 = memref.load %arg1[%c24] : memref<32xf32, #tpu.memory_space<smem>>
    %70 = vector.broadcast %67 : f32 to vector<1x128xf32>
    %71 = arith.mulf %0, %70 : vector<1x128xf32>
    %72 = vector.broadcast %68 : f32 to vector<1x128xf32>
    %73 = arith.addf %71, %72 : vector<1x128xf32>
    %cst_9 = arith.constant 0.000000e+00 : f32
    %74 = vector.broadcast %cst_9 : f32 to vector<1x128xf32>
    %75 = arith.subf %74, %73 : vector<1x128xf32>
    %76 = math.exp %75 : vector<1x128xf32>
    %cst_10 = arith.constant 1.000000e+00 : f32
    %77 = vector.broadcast %cst_10 : f32 to vector<1x128xf32>
    %78 = arith.addf %77, %76 : vector<1x128xf32>
    %79 = tpu.reciprocal %78 {approx = true} : vector<1x128xf32> -> vector<1x128xf32>
    %80 = vector.broadcast %69 : f32 to vector<1x128xf32>
    %81 = arith.mulf %80, %79 : vector<1x128xf32>
    %82 = arith.addf %66, %81 : vector<1x128xf32>
    %c5 = arith.constant 5 : index
    %83 = memref.load %arg1[%c5] : memref<32xf32, #tpu.memory_space<smem>>
    %c15 = arith.constant 15 : index
    %84 = memref.load %arg1[%c15] : memref<32xf32, #tpu.memory_space<smem>>
    %c25 = arith.constant 25 : index
    %85 = memref.load %arg1[%c25] : memref<32xf32, #tpu.memory_space<smem>>
    %86 = vector.broadcast %83 : f32 to vector<1x128xf32>
    %87 = arith.mulf %0, %86 : vector<1x128xf32>
    %88 = vector.broadcast %84 : f32 to vector<1x128xf32>
    %89 = arith.addf %87, %88 : vector<1x128xf32>
    %cst_11 = arith.constant 0.000000e+00 : f32
    %90 = vector.broadcast %cst_11 : f32 to vector<1x128xf32>
    %91 = arith.subf %90, %89 : vector<1x128xf32>
    %92 = math.exp %91 : vector<1x128xf32>
    %cst_12 = arith.constant 1.000000e+00 : f32
    %93 = vector.broadcast %cst_12 : f32 to vector<1x128xf32>
    %94 = arith.addf %93, %92 : vector<1x128xf32>
    %95 = tpu.reciprocal %94 {approx = true} : vector<1x128xf32> -> vector<1x128xf32>
    %96 = vector.broadcast %85 : f32 to vector<1x128xf32>
    %97 = arith.mulf %96, %95 : vector<1x128xf32>
    %98 = arith.addf %82, %97 : vector<1x128xf32>
    %c6 = arith.constant 6 : index
    %99 = memref.load %arg1[%c6] : memref<32xf32, #tpu.memory_space<smem>>
    %c16 = arith.constant 16 : index
    %100 = memref.load %arg1[%c16] : memref<32xf32, #tpu.memory_space<smem>>
    %c26 = arith.constant 26 : index
    %101 = memref.load %arg1[%c26] : memref<32xf32, #tpu.memory_space<smem>>
    %102 = vector.broadcast %99 : f32 to vector<1x128xf32>
    %103 = arith.mulf %0, %102 : vector<1x128xf32>
    %104 = vector.broadcast %100 : f32 to vector<1x128xf32>
    %105 = arith.addf %103, %104 : vector<1x128xf32>
    %cst_13 = arith.constant 0.000000e+00 : f32
    %106 = vector.broadcast %cst_13 : f32 to vector<1x128xf32>
    %107 = arith.subf %106, %105 : vector<1x128xf32>
    %108 = math.exp %107 : vector<1x128xf32>
    %cst_14 = arith.constant 1.000000e+00 : f32
    %109 = vector.broadcast %cst_14 : f32 to vector<1x128xf32>
    %110 = arith.addf %109, %108 : vector<1x128xf32>
    %111 = tpu.reciprocal %110 {approx = true} : vector<1x128xf32> -> vector<1x128xf32>
    %112 = vector.broadcast %101 : f32 to vector<1x128xf32>
    %113 = arith.mulf %112, %111 : vector<1x128xf32>
    %114 = arith.addf %98, %113 : vector<1x128xf32>
    %c7 = arith.constant 7 : index
    %115 = memref.load %arg1[%c7] : memref<32xf32, #tpu.memory_space<smem>>
    %c17 = arith.constant 17 : index
    %116 = memref.load %arg1[%c17] : memref<32xf32, #tpu.memory_space<smem>>
    %c27 = arith.constant 27 : index
    %117 = memref.load %arg1[%c27] : memref<32xf32, #tpu.memory_space<smem>>
    %118 = vector.broadcast %115 : f32 to vector<1x128xf32>
    %119 = arith.mulf %0, %118 : vector<1x128xf32>
    %120 = vector.broadcast %116 : f32 to vector<1x128xf32>
    %121 = arith.addf %119, %120 : vector<1x128xf32>
    %cst_15 = arith.constant 0.000000e+00 : f32
    %122 = vector.broadcast %cst_15 : f32 to vector<1x128xf32>
    %123 = arith.subf %122, %121 : vector<1x128xf32>
    %124 = math.exp %123 : vector<1x128xf32>
    %cst_16 = arith.constant 1.000000e+00 : f32
    %125 = vector.broadcast %cst_16 : f32 to vector<1x128xf32>
    %126 = arith.addf %125, %124 : vector<1x128xf32>
    %127 = tpu.reciprocal %126 {approx = true} : vector<1x128xf32> -> vector<1x128xf32>
    %128 = vector.broadcast %117 : f32 to vector<1x128xf32>
    %129 = arith.mulf %128, %127 : vector<1x128xf32>
    %130 = arith.addf %114, %129 : vector<1x128xf32>
    %c8 = arith.constant 8 : index
    %131 = memref.load %arg1[%c8] : memref<32xf32, #tpu.memory_space<smem>>
    %c18 = arith.constant 18 : index
    %132 = memref.load %arg1[%c18] : memref<32xf32, #tpu.memory_space<smem>>
    %c28 = arith.constant 28 : index
    %133 = memref.load %arg1[%c28] : memref<32xf32, #tpu.memory_space<smem>>
    %134 = vector.broadcast %131 : f32 to vector<1x128xf32>
    %135 = arith.mulf %0, %134 : vector<1x128xf32>
    %136 = vector.broadcast %132 : f32 to vector<1x128xf32>
    %137 = arith.addf %135, %136 : vector<1x128xf32>
    %cst_17 = arith.constant 0.000000e+00 : f32
    %138 = vector.broadcast %cst_17 : f32 to vector<1x128xf32>
    %139 = arith.subf %138, %137 : vector<1x128xf32>
    %140 = math.exp %139 : vector<1x128xf32>
    %cst_18 = arith.constant 1.000000e+00 : f32
    %141 = vector.broadcast %cst_18 : f32 to vector<1x128xf32>
    %142 = arith.addf %141, %140 : vector<1x128xf32>
    %143 = tpu.reciprocal %142 {approx = true} : vector<1x128xf32> -> vector<1x128xf32>
    %144 = vector.broadcast %133 : f32 to vector<1x128xf32>
    %145 = arith.mulf %144, %143 : vector<1x128xf32>
    %146 = arith.addf %130, %145 : vector<1x128xf32>
    %c9 = arith.constant 9 : index
    %147 = memref.load %arg1[%c9] : memref<32xf32, #tpu.memory_space<smem>>
    %c19 = arith.constant 19 : index
    %148 = memref.load %arg1[%c19] : memref<32xf32, #tpu.memory_space<smem>>
    %c29 = arith.constant 29 : index
    %149 = memref.load %arg1[%c29] : memref<32xf32, #tpu.memory_space<smem>>
    %150 = vector.broadcast %147 : f32 to vector<1x128xf32>
    %151 = arith.mulf %0, %150 : vector<1x128xf32>
    %152 = vector.broadcast %148 : f32 to vector<1x128xf32>
    %153 = arith.addf %151, %152 : vector<1x128xf32>
    %cst_19 = arith.constant 0.000000e+00 : f32
    %154 = vector.broadcast %cst_19 : f32 to vector<1x128xf32>
    %155 = arith.subf %154, %153 : vector<1x128xf32>
    %156 = math.exp %155 : vector<1x128xf32>
    %cst_20 = arith.constant 1.000000e+00 : f32
    %157 = vector.broadcast %cst_20 : f32 to vector<1x128xf32>
    %158 = arith.addf %157, %156 : vector<1x128xf32>
    %159 = tpu.reciprocal %158 {approx = true} : vector<1x128xf32> -> vector<1x128xf32>
    %160 = vector.broadcast %149 : f32 to vector<1x128xf32>
    %161 = arith.mulf %160, %159 : vector<1x128xf32>
    %162 = arith.addf %146, %161 : vector<1x128xf32>
    %c0_21 = arith.constant 0 : index
    %c0_22 = arith.constant 0 : index
    %163 = vector.load %arg3[%c0_21, %c0_22] : memref<1x128xf32, #tpu.memory_space<vmem>>, vector<1x128xf32>
    tpu.vector_store %arg3[%c0_21, %c0_22], %162 {strides = array<i32>} : memref<1x128xf32, #tpu.memory_space<vmem>>, vector<1x128xf32>,
    return
  }
  func.func @transform_0(%arg0: i32) -> i32 {
    %c0_i32 = arith.constant 0 : i32
    %c0_i32_0 = arith.constant 0 : i32
    return %c0_i32 : i32
  }
  func.func @transform_1(%arg0: i32) -> (i32, i32) {
    %c0_i32 = arith.constant 0 : i32
    %c0_i32_0 = arith.constant 0 : i32
    return %arg0, %c0_i32 : i32, i32
  }
  func.func @transform_2(%arg0: i32) -> (i32, i32) {
    %c0_i32 = arith.constant 0 : i32
    %c0_i32_0 = arith.constant 0 : i32
    return %arg0, %c0_i32 : i32, i32
  }
}

</mosaic_0001>

<bundles_post_ra>
// kernel: tpu_custom_call.1
= control target key start
LH: loop header
LB: loop body
LE: loop exit
PB: predicated region body
PF: predicated region fallthrough
CT: control target
= control target key end

     0   :  { %7 = vsyncpa [#allocation4], 0  ;;  %s413_s0 = inlined_call_operand.hbm [shape: f32[32], index: 0, kind: input, shape index: {}]   ;;  %s414_s1 = inlined_call_operand.vmem [shape: f32[1,128], index: 1, kind: input, shape index: {}]   ;;  %s415_s2 = inlined_call_operand.hbm [shape: f32[1,128], index: 2, kind: output, shape index: {}]  }
   0x1   :  { %8 = vsyncpa [#allocation3], 0  ;;  %s264_s11 = scalar_lea.hbm %s413_s0, 16 }
   0x2   :  { %p265_p0 = scmp.ne.s32.totalorder %s413_s0, %s264_s11  ;;  %p268_p1 = scmp.lt.u32.totalorder %s264_s11, %s413_s0 }
   0x4   :  { %p270_p2 = pnand %p268_p1, %p265_p0 }
   0x6   :  { %273 = shalt.err (!%p270_p2)
}
   0x7   :  { %s300_s16 = smov [#allocation2]  }
   0x8   :  { %16 = dma.hbm_to_smem %s413_s0, 16, %s300_s16, [#allocation4]  }
   0x9   :  { %296 = dma.done.wait [#allocation4], 16  }
   0xa   :  { %297 = vsyncadd [#allocation4], 4294967280 }
   0xb   :  { %22 = sfence }
   0xc   :  { %s26_s19 = sld [smem:[#allocation2]]  ;;  %s193_s20 = sld [smem:[#allocation2 + $0xa]]  ;;  %v332_v0 = vld [vmem:[%s414_s1] sm:$0x1] }
   0xd   :  { %s195_s21 = sld [smem:[#allocation2 + $0x1]]  ;;  %s196_s22 = sld [smem:[#allocation2 + $0xb]] }
   0xe   :  { %s198_s23 = sld [smem:[#allocation2 + $0x2]]  ;;  %s199_s26 = sld [smem:[#allocation2 + $0xc]] }
   0xf   :  { %s201_s27 = sld [smem:[#allocation2 + $0x3]]  ;;  %s334_s28 = sld [smem:[#allocation2 + $0xd]] }
  0x10   :  { %s204_s29 = sld [smem:[#allocation2 + $0x4]]  ;;  %s337_s0 = sld [smem:[#allocation2 + $0xe]] }
  0x11   :  { %s207_s30 = sld [smem:[#allocation2 + $0x5]]  ;;  %s339_s3 = sld [smem:[#allocation2 + $0xf]] }
  0x12   :  { %v29_v1 = vstv %s26_s19  ;;  %v31_v3 = vstv %s193_s20  ;;  %s342_s1 = sld [smem:[#allocation2 + $0x6]]  ;;  %s345_s4 = sld [smem:[#allocation2 + $0x10]] }
  0x13   :  { %v30_v2 = vmul.f32 %v29_v1, %v332_v0  ;;  %v44_v4 = vstv %s195_s21  ;;  %v46_v5 = vstv %s196_s22  ;;  %s348_s5 = sld [smem:[#allocation2 + $0x7]]  ;;  %s351_s6 = sld [smem:[#allocation2 + $0x11]] }
  0x14   :  { %v45_v7 = vmul.f32 %v44_v4, %v332_v0  ;;  %v59_v8 = vstv %s198_s23  ;;  %v61_v10 = vstv %s199_s26  ;;  %s355_s7 = sld [smem:[#allocation2 + $0x8]]  ;;  %s357_s8 = sld [smem:[#allocation2 + $0x12]] }
  0x15   :  { %v32_v6 = vadd.f32 %v31_v3, %v30_v2  ;;  %v60_v9 = vmul.f32 %v59_v8, %v332_v0  ;;  %v74_v13 = vstv %s201_s27  ;;  %v76_v14 = vstv %s334_s28  ;;  %s360_s9 = sld [smem:[#allocation2 + $0x9]]  ;;  %s362_s10 = sld [smem:[#allocation2 + $0x13]] }
  0x16   :  { %v47_v12 = vadd.f32 %v46_v5, %v45_v7  ;;  %v75_v16 = vmul.f32 %v74_v13, %v332_v0  ;;  %v89_v17 = vstv %s204_s29  ;;  %v91_v21 = vstv %s337_s0  ;;  %s377_s11 = sld [smem:[#allocation2 + $0x14]]  ;;  %s379_s12 = sld [smem:[#allocation2 + $0x1e]] }
  0x17   :  { %v33_v11 = vsub.f32 0.0, %v32_v6  ;;  %v62_v15 = vadd.f32 %v61_v10, %v60_v9  ;;  %v90_v20 = vmul.f32 %v89_v17, %v332_v0  ;;  %v104_v24 = vstv %s207_s30  ;;  %s381_s13 = sld [smem:[#allocation2 + $0x15]]  ;;  %s383_s14 = sld [smem:[#allocation2 + $0x16]] }
  0x18   :  { %v48_v19 = vsub.f32 0.0, %v47_v12  ;;  %v77_v23 = vadd.f32 %v76_v14, %v75_v16  ;;  %v105_v27 = vmul.f32 %v104_v24, %v332_v0  ;;  %v106_v30 = vstv %s339_s3  ;;  %s385_s15 = sld [smem:[#allocation2 + $0x17]]  ;;  %s387_s16 = sld [smem:[#allocation2 + $0x18]] }
  0x19   :  { %v34_v18 = vmul.f32 1.442695, %v33_v11  ;;  %v63_v22 = vsub.f32 0.0, %v62_v15  ;;  %v92_v26 = vadd.f32 %v91_v21, %v90_v20  ;;  %v119_v33 = vstv %s342_s1  ;;  %s390_s17 = sld [smem:[#allocation2 + $0x19]]  ;;  %s395_s18 = sld [smem:[#allocation2 + $0x1a]] }
  0x1a   :  { %v49_v25 = vmul.f32 1.442695, %v48_v19  ;;  %v78_v29 = vsub.f32 0.0, %v77_v23  ;;  %v107_v32 = vadd.f32 %v106_v30, %v105_v27  ;;  %v120_v35 = vmul.f32 %v119_v33, %v332_v0  ;;  %s215_s19 = sld [smem:[#allocation2 + $0x1b]]  ;;  %s218_s20 = sld [smem:[#allocation2 + $0x1c]] }
  0x1b   :  { %224 = vpow2.f32 %v34_v18  ;;  %v64_v28 = vmul.f32 1.442695, %v63_v22  ;;  %v93_v31 = vsub.f32 0.0, %v92_v26  ;;  %v121_v36 = vstv %s345_s4  ;;  %s221_s21 = sld [smem:[#allocation2 + $0x1d]]  ;;  %s301_s22 = smov [#allocation5]  }
  0x1c   :  { %226 = vpow2.f32 %v49_v25  ;;  %v79_v34 = vmul.f32 1.442695, %v78_v29  ;;  %v108_v38 = vsub.f32 0.0, %v107_v32  ;;  %v134_v39 = vstv %s348_s5  ;;  %s183_s23 = sshll.u32 %s301_s22, 4  ;;  %s184_s23 = int_to_ptr.vmem [resolvable:$true] %s183_s23 }
  0x1d   :  { %228 = vpow2.f32 %v64_v28  ;;  %v94_v37 = vmul.f32 1.442695, %v93_v31  ;;  %v122_v40 = vadd.f32 %v121_v36, %v120_v35  ;;  %v135_v41 = vmul.f32 %v134_v39, %v332_v0  ;;  %s274_s24 = scalar_lea.vmem %s184_s23, 16  ;;  %s278_s25 = scalar_lea.vmem %s184_s23, 32 }
  0x1e   :  { %230 = vpow2.f32 %v79_v34  ;;  %v136_v42 = vstv %s351_s6  ;;  %v109_v43 = vmul.f32 1.442695, %v108_v38  ;;  %v149_v44 = vstv %s355_s7  ;;  %p275_p3 = scmp.ne.s32.totalorder %s184_s23, %s274_s24  ;;  %p279_p4 = scmp.lt.s32.totalorder %s184_s23, %s184_s23 }
  0x1f   :  { %232 = vpow2.f32 %v94_v37  ;;  %v123_v45 = vsub.f32 0.0, %v122_v40  ;;  %v137_v46 = vadd.f32 %v136_v42, %v135_v41  ;;  %v150_v47 = vmul.f32 %v149_v44, %v332_v0  ;;  %p280_p5 = scmp.lt.s32.totalorder %s278_s25, %s274_s24 }
  0x20   :  { %v151_v48 = vstv %s357_s8  ;;  %234 = vpow2.f32 %v109_v43  ;;  %v164_v49 = vstv %s360_s9  ;;  %v166_v50 = vstv %s362_s10 }
  0x21   :  { %v124_v51 = vmul.f32 1.442695, %v123_v45  ;;  %v138_v52 = vsub.f32 0.0, %v137_v46  ;;  %v152_v53 = vadd.f32 %v151_v48, %v150_v47  ;;  %v165_v54 = vmul.f32 %v164_v49, %v332_v0  ;;  %p281_p6 = por %p280_p5, %p279_p4 }
  0x22   :  { %v38_v10 = vstv %s377_s11  ;;  %v25_v13 = vstv %s379_s12  ;;  %v53_v14 = vstv %s381_s13  ;;  %v68_v17 = vstv %s383_s14 }
  0x23   :  { %236 = vpow2.f32 %v124_v51  ;;  %v139_v57 = vmul.f32 1.442695, %v138_v52  ;;  %v153_v58 = vsub.f32 0.0, %v152_v53  ;;  %v167_v60 = vadd.f32 %v166_v50, %v165_v54  ;;  %p282_p7 = pnand %p281_p6, %p275_p3 }
  0x24   :  { %v83_v23 = vstv %s385_s15  ;;  %v98_v26 = vstv %s387_s16  ;;  %v113_v32 = vstv %s390_s17  ;;  %v128_v40 = vstv %s395_s18 }
  0x25   :  { %v225_v55 = vpop.eup %224  ;;  %v154_v63 = vmul.f32 1.442695, %v153_v58  ;;  %v168_v2 = vsub.f32 0.0, %v167_v60  ;;  %v143_v44 = vstv %s215_s19  ;;  %v158_v49 = vstv %s218_s20 }
  0x26   :  { %v36_v56 = vadd.f32 1.0, %v225_v55  ;;  %v227_v59 = vpop.eup %226  ;;  %v173_v53 = vstv %s221_s21 }
  0x27   :  { %v229_v61 = vpop.eup %228  ;;  %v51_v62 = vadd.f32 1.0, %v227_v59  ;;  %v169_v5 = vmul.f32 1.442695, %v168_v2 }
  0x28   :  { %238 = vrcp.f32 %v36_v56  ;;  %v66_v1 = vadd.f32 1.0, %v229_v61  ;;  %v231_v3 = vpop.eup %230 }
  0x29   :  { %240 = vpow2.f32 %v139_v57  ;;  %v233_v0 = vpop.eup %232  ;;  %v81_v4 = vadd.f32 1.0, %v231_v3 }
  0x2a   :  { %242 = vrcp.f32 %v51_v62  ;;  %v96_v6 = vadd.f32 1.0, %v233_v0  ;;  %v235_v7 = vpop.eup %234 }
  0x2b   :  { %244 = vrcp.f32 %v66_v1  ;;  %v111_v8 = vadd.f32 1.0, %v235_v7 }
  0x2c   :  { %246 = vpow2.f32 %v154_v63 }
  0x2d   :  { %248 = vrcp.f32 %v81_v4  ;;  %v237_v9 = vpop.eup %236 }
  0x2e   :  { %250 = vrcp.f32 %v96_v6  ;;  %v126_v11 = vadd.f32 1.0, %v237_v9 }
  0x2f   :  { %252 = vpow2.f32 %v169_v5 }
  0x30   :  { %254 = vrcp.f32 %v111_v8 }
  0x31   :  { %256 = vrcp.f32 %v126_v11 }
  0x32   :  { %v239_v12 = vpop.eup %238 }
  0x33   :  { %v241_v15 = vpop.eup %240  ;;  %v39_v16 = vmul.f32 %v239_v12, %v38_v10 }
  0x34   :  { %v243_v18 = vpop.eup %242  ;;  %v141_v19 = vadd.f32 1.0, %v241_v15 }
  0x35   :  { %v245_v20 = vpop.eup %244  ;;  %v40_v21 = vadd.f32 %v39_v16, %v25_v13  ;;  %v54_v22 = vmul.f32 %v243_v18, %v53_v14 }
  0x36   :  { %v247_v24 = vpop.eup %246  ;;  %v69_v25 = vmul.f32 %v245_v20, %v68_v17  ;;  %258 = vrcp.f32 %v141_v19 }
  0x37   :  { %v249_v27 = vpop.eup %248  ;;  %v55_v28 = vadd.f32 %v54_v22, %v40_v21  ;;  %v156_v29 = vadd.f32 1.0, %v247_v24 }
  0x38   :  { %v251_v30 = vpop.eup %250  ;;  %v84_v31 = vmul.f32 %v249_v27, %v83_v23 }
  0x39   :  { %v253_v33 = vpop.eup %252  ;;  %v70_v34 = vadd.f32 %v69_v25, %v55_v28  ;;  %v99_v35 = vmul.f32 %v251_v30, %v98_v26  ;;  %260 = vrcp.f32 %v156_v29 }
  0x3a   :  { %v255_v36 = vpop.eup %254  ;;  %v171_v37 = vadd.f32 1.0, %v253_v33 }
  0x3b   :  { %v85_v38 = vadd.f32 %v84_v31, %v70_v34  ;;  %v114_v39 = vmul.f32 %v255_v36, %v113_v32  ;;  %v257_v41 = vpop.eup %256 }
  0x3c   :  { %262 = vrcp.f32 %v171_v37  ;;  %v129_v43 = vmul.f32 %v257_v41, %v128_v40 }
  0x3d   :  { %v100_v42 = vadd.f32 %v99_v35, %v85_v38 }
  0x3f   :  { %v115_v45 = vadd.f32 %v114_v39, %v100_v42 }
  0x40   :  { %v259_v46 = vpop.eup %258 }
  0x41   :  { %v130_v47 = vadd.f32 %v129_v43, %v115_v45  ;;  %v144_v48 = vmul.f32 %v259_v46, %v143_v44 }
  0x43   :  { %v261_v50 = vpop.eup %260  ;;  %v145_v51 = vadd.f32 %v144_v48, %v130_v47 }
  0x44   :  { %v159_v52 = vmul.f32 %v261_v50, %v158_v49 }
  0x46   :  { %v263_v54 = vpop.eup %262  ;;  %v160_v55 = vadd.f32 %v159_v52, %v145_v51 }
  0x47   :  { %v174_v56 = vmul.f32 %v263_v54, %v173_v53 }
  0x49   :  { %v175_v57 = vadd.f32 %v174_v56, %v160_v55 }
  0x4b   :  { %176 = vst [vmem:[#allocation5] sm:$0x1] %v175_v57 }
  0x4c   :  { %285 = shalt.err (!%p282_p7)
}
  0x4d   :  { %s286_s28 = scalar_lea.hbm %s415_s2, 16 }
  0x4e   :  { %p287_p8 = scmp.ne.s32.totalorder %s415_s2, %s286_s28  ;;  %p290_p9 = scmp.lt.u32.totalorder %s286_s28, %s415_s2 }
  0x50   :  { %p292_p10 = pnand %p290_p9, %p287_p8 }
  0x52   :  { %295 = shalt.err (!%p292_p10)
}
  0x53   :  { %186 = dma.vmem_to_hbm [thread:$0]  %s184_s23, 16, %s415_s2, [#allocation3]  }
  0x54   :  { %298 = dma.done.wait [#allocation3], 16  }
  0x55   :  { %299 = vsyncadd [#allocation3], 4294967280 }
  0x56   :  { %190 = vsyncpa [#allocation3], 1 }
  0x57   :  { %191 = vsyncpa [#allocation4], 1 }

</bundles_post_ra>
